<compile_context>
chip_gen: v5e
topology: v5e:2x2
jax: 0.10.0
libtpu: 0.0.40
codegen_flags: <defaults>
</compile_context>

<pallas_src>
import jax
import jax.numpy as jnp
from jax.experimental import pallas as pl
from jax.experimental.pallas import tpu as pltpu


IN_FEATURES = 42      # fixed by nn.Linear(42, num_classes)
NUM_CLASSES = 10      # small num_classes for the synthetic example
BATCH = 8             # small batch (multiple of 8 -> sublane aligned)

F_PAD = 48            # contraction pad: next multiple of 8 above 42
C_PAD = 128           # padded class dim (lane-dense, unmasked output stores)
TILE_BATCH = 256      # batch tile once B grows (fills 256-row MXU on v6e/v7x)


def linear_kernel(x_ref, w_ref, b_ref, o_ref, xp_ref):
    """y = x @ W^T + b with K padded to 48 and N padded to 128.

    x_ref : (R, 42)   f32 VMEM   raw, unpadded activations (R = rows in tile)
    w_ref : (48, 128) f32 VMEM   zero-padded W^T (prepared once at init)
    b_ref : (1, 128)  f32 VMEM   zero-padded bias
    o_ref : (R, 128)  f32 VMEM   lane-dense output (cols >= num_classes are 0)
    xp_ref: (R, 48)   f32 VMEM   scratch for K-padded activations
    """
    rows = xp_ref.shape[0]
    # Zero ONLY the 6 tail lanes (uninitialized VMEM may hold NaNs and
    # NaN * 0-weight = NaN), then place the 42 real features. No full-tile
    # zero-fill, no extra full-width vst.
    xp_ref[:, IN_FEATURES:] = jnp.zeros((rows, F_PAD - IN_FEATURES), jnp.float32)
    xp_ref[:, :IN_FEATURES] = x_ref[...]

    # Single MXU pass with f32 accumulation, bias add on the VPU, and a
    # fully lane-dense (unmasked) store of the result.
    o_ref[...] = (
        jnp.dot(xp_ref[...], w_ref[...], preferred_element_type=jnp.float32)
        + b_ref[...]
    )


def prepare_params(weight, bias, f_pad=F_PAD, c_pad=C_PAD):
    """One-time (init-time) parameter prep: transpose + zero-pad W and b.

    weight: (num_classes, 42) f32  -- PyTorch nn.Linear layout
    bias:   (num_classes,)    f32
    returns w_pad (f_pad, c_pad), b_pad (1, c_pad) — cached, reused per call.
    """
    num_classes, in_features = weight.shape
    w_pad = (
        jnp.zeros((f_pad, c_pad), jnp.float32)
        .at[:in_features, :num_classes]
        .set(weight.T.astype(jnp.float32))
    )
    b_pad = (
        jnp.zeros((1, c_pad), jnp.float32)
        .at[0, :num_classes]
        .set(bias.astype(jnp.float32))
    )
    return w_pad, b_pad


def _cost_estimate(batch):
    # True cost of this layer (not the padded GEMM): ~6.7 KFLOP at B=8.
    return pl.CostEstimate(
        flops=2 * batch * IN_FEATURES * NUM_CLASSES,
        transcendentals=0,
        bytes_accessed=4 * (batch * IN_FEATURES       # x
                            + F_PAD * C_PAD           # padded W^T
                            + C_PAD                   # padded bias
                            + batch * C_PAD),         # padded y
    )


def my_image_network_forward(x, w_pad, b_pad):
    """Forward pass of MyImageNetwork (the Linear(42, num_classes) layer).

    Returns the LANE-DENSE padded output (B, C_PAD); columns
    [:NUM_CLASSES] hold the exact Linear output and columns
    [NUM_CLASSES:] are exact zeros (consumers mask/ignore them).
    """
    B, F = x.shape
    assert F == IN_FEATURES

    if B > TILE_BATCH and B % TILE_BATCH == 0:
        # Batch-tiled path for large B: rows split across the grid
        # ("parallel" -> v7x's two TensorCores each take half), W^T and bias
        # whole-array resident (index_map ignores the grid axis).
        return pl.pallas_call(
            linear_kernel,
            out_shape=jax.ShapeDtypeStruct((B, C_PAD), jnp.float32),
            grid=(B // TILE_BATCH,),
            in_specs=[
                pl.BlockSpec((TILE_BATCH, IN_FEATURES), lambda i: (i, 0)),  # x
                pl.BlockSpec((F_PAD, C_PAD), lambda i: (0, 0)),             # W^T
                pl.BlockSpec((1, C_PAD), lambda i: (0, 0)),                 # bias
            ],
            out_specs=pl.BlockSpec((TILE_BATCH, C_PAD), lambda i: (i, 0)),
            scratch_shapes=[pltpu.VMEM((TILE_BATCH, F_PAD), jnp.float32)],
            compiler_params=pltpu.CompilerParams(
                dimension_semantics=("parallel",)),
            cost_estimate=_cost_estimate(B),
        )(x, w_pad, b_pad)

    # Gridless path (default at B=8): whole arrays resident in VMEM, no
    # pipeline prologue/epilogue or double-buffering for a 1-point grid.
    return pl.pallas_call(
        linear_kernel,
        out_shape=jax.ShapeDtypeStruct((B, C_PAD), jnp.float32),
        in_specs=[
            pl.BlockSpec(memory_space=pltpu.MemorySpace.VMEM),  # x
            pl.BlockSpec(memory_space=pltpu.MemorySpace.VMEM),  # W^T (padded)
            pl.BlockSpec(memory_space=pltpu.MemorySpace.VMEM),  # bias (padded)
        ],
        out_specs=pl.BlockSpec(memory_space=pltpu.MemorySpace.VMEM),
        scratch_shapes=[pltpu.VMEM((B, F_PAD), jnp.float32)],
        cost_estimate=_cost_estimate(B),
    )(x, w_pad, b_pad)


def my_image_network_forward_exact(x, w_pad, b_pad, num_classes=NUM_CLASSES):
    """Shape-exact (B, num_classes) variant — only for consumers that cannot
    accept the lane-dense padded output (the slice is a separate XLA op that
    costs about as much as the kernel at this size; prefer the padded form)."""
    return my_image_network_forward(x, w_pad, b_pad)[:, :num_classes]


def init_params(key, in_features=IN_FEATURES, num_classes=NUM_CLASSES):
    # Deterministic init mimicking PyTorch nn.Linear default:
    # U(-1/sqrt(fan_in), 1/sqrt(fan_in)) for both weight and bias.
    k_w, k_b = jax.random.split(key)
    bound = 1.0 / jnp.sqrt(jnp.float32(in_features))
    weight = jax.random.uniform(
        k_w, (num_classes, in_features), jnp.float32, -bound, bound)
    bias = jax.random.uniform(
        k_b, (num_classes,), jnp.float32, -bound, bound)
    return weight, bias


# TODO(synk): block1/block2 conv stacks, Dropout and the Adam optimizer are
# never used by forward(); they are intentionally not implemented.

if __name__ == "__main__":
    key = jax.random.PRNGKey(0)
    k_x, k_p, k_xb = jax.random.split(key, 3)

    weight, bias = init_params(k_p)
    # Hoisted, one-time parameter preparation (no per-call transpose/reshape).
    w_pad, b_pad = prepare_params(weight, bias)

    # --- small batch: gridless path -------------------------------------
    x = jax.random.normal(k_x, (BATCH, IN_FEATURES), jnp.float32)
    y_pad = my_image_network_forward(x, w_pad, b_pad)
    y_pad = jax.block_until_ready(y_pad)

    y_ref = x @ weight.T + bias
    assert y_pad.shape == (BATCH, C_PAD)
    # Slice only here, in the host-side check (not on the hot path).
    assert jnp.allclose(y_pad[:, :NUM_CLASSES], y_ref, atol=1e-5, rtol=1e-5)
    assert jnp.allclose(y_pad[:, NUM_CLASSES:], 0.0)

    # --- larger batch: exercises the batch-tiled "parallel" path ---------
    BIG = 2 * TILE_BATCH
    xb = jax.random.normal(k_xb, (BIG, IN_FEATURES), jnp.float32)
    yb_pad = my_image_network_forward(xb, w_pad, b_pad)
    yb_pad = jax.block_until_ready(yb_pad)

    yb_ref = xb @ weight.T + bias
    assert yb_pad.shape == (BIG, C_PAD)
    assert jnp.allclose(yb_pad[:, :NUM_CLASSES], yb_ref, atol=1e-5, rtol=1e-5)
    assert jnp.allclose(yb_pad[:, NUM_CLASSES:], 0.0)

    print("KERNEL_OK")
</pallas_src>

<mosaic_0001>
module attributes {stable_mosaic.version = 11 : i64} {
  func.func @linear_kernel(%arg0: memref<8x42xf32, #tpu.memory_space<vmem>>, %arg1: memref<48x128xf32, #tpu.memory_space<vmem>>, %arg2: memref<1x128xf32, #tpu.memory_space<vmem>>, %arg3: memref<8x128xf32, #tpu.memory_space<vmem>>, %arg4: memref<8x48xf32, #tpu.memory_space<vmem>>) attributes {dimension_semantics = [], scalar_prefetch = 0 : i64, scratch_operands = 1 : i64, tpu.core_type = #tpu.core_type<tc>} {
    %cst = arith.constant 0.000000e+00 : f32
    %0 = vector.broadcast %cst : f32 to vector<8x6xf32>
    %c0 = arith.constant 0 : index
    %c42 = arith.constant 42 : index
    %1 = vector.load %arg4[%c0, %c42] : memref<8x48xf32, #tpu.memory_space<vmem>>, vector<8x6xf32>
    tpu.vector_store %arg4[%c0, %c42], %0 {strides = array<i32>} : memref<8x48xf32, #tpu.memory_space<vmem>>, vector<8x6xf32>,
    %c0_0 = arith.constant 0 : index
    %c0_1 = arith.constant 0 : index
    %2 = vector.load %arg0[%c0_0, %c0_1] : memref<8x42xf32, #tpu.memory_space<vmem>>, vector<8x42xf32>
    %c0_2 = arith.constant 0 : index
    %c0_3 = arith.constant 0 : index
    %3 = vector.load %arg4[%c0_2, %c0_3] : memref<8x48xf32, #tpu.memory_space<vmem>>, vector<8x42xf32>
    tpu.vector_store %arg4[%c0_2, %c0_3], %2 {strides = array<i32>} : memref<8x48xf32, #tpu.memory_space<vmem>>, vector<8x42xf32>,
    %c0_4 = arith.constant 0 : index
    %c0_5 = arith.constant 0 : index
    %4 = vector.load %arg4[%c0_4, %c0_5] : memref<8x48xf32, #tpu.memory_space<vmem>>, vector<8x48xf32>
    %c0_6 = arith.constant 0 : index
    %c0_7 = arith.constant 0 : index
    %5 = vector.load %arg1[%c0_6, %c0_7] : memref<48x128xf32, #tpu.memory_space<vmem>>, vector<48x128xf32>
    %cst_8 = arith.constant dense<0.000000e+00> : vector<8x128xf32>
    %6 = tpu.matmul %4, %5, %cst_8 {dimension_numbers = #tpu.dot_dimension_numbers<[1], [0], [0], [1], [0, 0, 1, 1], [], []>} : vector<8x48xf32>, vector<48x128xf32>, vector<8x128xf32> -> vector<8x128xf32>
    %c0_9 = arith.constant 0 : index
    %c0_10 = arith.constant 0 : index
    %7 = vector.load %arg2[%c0_9, %c0_10] : memref<1x128xf32, #tpu.memory_space<vmem>>, vector<1x128xf32>
    %8 = vector.broadcast %7 : vector<1x128xf32> to vector<8x128xf32>
    %9 = arith.addf %6, %8 : vector<8x128xf32>
    %c0_11 = arith.constant 0 : index
    %c0_12 = arith.constant 0 : index
    %10 = vector.load %arg3[%c0_11, %c0_12] : memref<8x128xf32, #tpu.memory_space<vmem>>, vector<8x128xf32>
    tpu.vector_store %arg3[%c0_11, %c0_12], %9 {strides = array<i32>} : memref<8x128xf32, #tpu.memory_space<vmem>>, vector<8x128xf32>,
    return
  }
}

</mosaic_0001>

<bundles_post_ra>
// kernel: tpu_custom_call.1
= control target key start
LH: loop header
LB: loop body
LE: loop exit
PB: predicated region body
PF: predicated region fallthrough
CT: control target
= control target key end

     0   :  { %8 = vsyncpa [#allocation4], 0  ;;  %s228_s0 = inlined_call_operand.hbm [shape: f32[8,42], index: 0, kind: input, shape index: {}]   ;;  %s229_s1 = inlined_call_operand.hbm [shape: f32[48,128], index: 1, kind: input, shape index: {}]   ;;  %s230_s2 = inlined_call_operand.vmem [shape: f32[1,128], index: 2, kind: input, shape index: {}]   ;;  %s231_s3 = inlined_call_operand.hbm [shape: f32[8,128], index: 3, kind: output, shape index: {}]  }
   0x1   :  { %9 = vsyncpa [#allocation7], 0 }
   0x2   :  { %10 = vsyncpa [#allocation5], 0  ;;  %s16_s14 = sshll.u32 %s228_s0, 4  ;;  %s190_s15 = smov [#allocation3]   ;;  %s17_s14 = int_to_ptr.hbm [resolvable:$true] %s16_s14 }
   0x3   :  { %s18_s16 = sshll.u32 %s190_s15, 4  ;;  %s26_s19 = sshll.u32 %s229_s1, 4  ;;  %s19_s16 = int_to_ptr.vmem [resolvable:$true] %s18_s16  ;;  %s27_s19 = int_to_ptr.hbm [resolvable:$true] %s26_s19 }
   0x4   :  { %21 = dma.hbm_to_vmem [thread:$0]  %s17_s14, 128, %s19_s16, [#allocation4]  }
   0x5   :  { %s191_s20 = smov [#allocation6]   ;;  %s192_s22 = smov 128  }
   0x6   :  { %s28_s21 = sshll.u32 %s191_s20, 4  ;;  %s193_s23 = smov 8   ;;  %s29_s21 = int_to_ptr.vmem [resolvable:$true] %s28_s21 }
   0x7   :  { %34 = dma.hbm_to_vmem [thread:$0]  %s27_s19, 768, %s29_s21, [#allocation7], %s192_s22, %s192_s22, %s193_s23  }
   0x8   :  { %184 = dma.done.wait [#allocation4], 128  }
   0x9   :  { %185 = vsyncadd [#allocation4], 4294967168 }
   0xa   :  { %186 = dma.done.wait [#allocation7], 768  }
   0xb   :  { %187 = vsyncadd [#allocation7], 4294966528  ;;  %vm45_vm0 = vcmask 392528   ;;  %v194_v0 = vmov 0.0   ;;  %v56_v1 = vld [vmem:[#allocation6 + $0x28] sm:$0xff]  ;;  %v55_v2 = vld [vmem:[#allocation6 + $0x20] sm:$0xff] }
   0xc   :  { %46 = vst.msk [vmem:[#allocation2] sm:$0xff] %vm45_vm0, %v194_v0  ;;  %vm48_vm1 = vcmask 343040   ;;  %75 = vmatpush.msra.mxu0 %v56_v1  ;;  %v54_v3 = vld [vmem:[#allocation6 + $0x18] sm:$0xff]  ;;  %v53_v5 = vld [vmem:[#allocation6 + $0x10] sm:$0xff]  ;;  %v52_v6 = vld [vmem:[#allocation6 + $0x8] sm:$0xff]  ;;  %vm61_vm2 = vcmask 392192  }
   0xd   :  { %v47_v4 = vld [vmem:[#allocation3] sm:$0xff]  ;;  %v51_v7 = vld [vmem:[#allocation6] sm:$0xff]  ;;  %v111_v9 = vld [vmem:[%s230_s2] ss:$0 sm:$0xff]  ;;  %s195_s24 = smov [#allocation8]   ;;  %s93_s28 = sshll.u32 %s231_s3, 4  ;;  %s94_s28 = int_to_ptr.hbm [resolvable:$true] %s93_s28 }
   0xe   :  { %76 = vmatpush.msra.mxu0 %v55_v2  ;;  %49 = vst.msk [vmem:[#allocation2] sm:$0xff] %vm48_vm1, %v47_v4  ;;  %s91_s25 = sshll.u32 %s195_s24, 4  ;;  %s92_s25 = int_to_ptr.vmem [resolvable:$true] %s91_s25 }
  0x10   :  { %77 = vmatpush.msra.mxu0 %v54_v3 }
  0x12   :  { %78 = vmatpush.msra.mxu0 %v53_v5 }
  0x14   :  { %79 = vmatpush.msra.mxu0 %v52_v6 }
  0x15   :  { %v50_v8 = vld [vmem:[#allocation2] sm:$0xff] }
  0x16   :  { %80 = vmatpush.msra.mxu0 %v51_v7 }
  0x17   :  { %104 = vmatmul.msk.f32.vlgmr.msra.gmra.mxu0 %vm61_vm2, %v50_v8 }
  0x94   :  { %v82_v10 = vpop.f32.mrf.mxu0 }
  0x95   :  { %v83_v11 = vadd.f32 %v111_v9, %v82_v10 }
  0x97   :  { %85 = vst [vmem:[#allocation8] sm:$0xff] %v83_v11 }
  0x98   :  { %96 = dma.vmem_to_hbm [thread:$0]  %s92_s25, 128, %s94_s28, [#allocation5]  }
  0x99   :  { %188 = dma.done.wait [#allocation5], 128  }
  0x9a   :  { %189 = vsyncadd [#allocation5], 4294967168 }
  0x9b   :  { %101 = vsyncpa [#allocation4], 1 }
  0x9c   :  { %102 = vsyncpa [#allocation7], 1 }
  0x9d   :  { %103 = vsyncpa [#allocation5], 1 }

</bundles_post_ra>
